<compile_context>
chip_gen: v7x
topology: tpu7x:2x2x1
jax: 0.10.0
libtpu: 0.0.40
codegen_flags: <defaults>
</compile_context>

<pallas_src>
import functools
import math

import jax
import jax.numpy as jnp
import numpy as np
from jax import lax
from jax.experimental import pallas as pl
from jax.experimental.pallas import tpu as pltpu


# ----------------------------- elementwise helpers ---------------------------

def _erf_approx(x):
    # Abramowitz & Stegun 7.1.26; max abs error ~1.5e-7.
    a1, a2, a3, a4, a5 = (0.254829592, -0.284496736, 1.421413741,
                          -1.453152027, 1.061405429)
    p = 0.3275911
    ax = jnp.abs(x)
    t = 1.0 / (1.0 + p * ax)
    poly = ((((a5 * t + a4) * t + a3) * t + a2) * t + a1) * t
    y = 1.0 - poly * jnp.exp(-ax * ax)
    return jnp.where(x >= 0.0, y, -y)


def _gelu_exact(x):
    return 0.5 * x * (1.0 + _erf_approx(x * 0.7071067811865476))


# --------------------------------- kernel ------------------------------------

def _linoss_block_kernel(x_ref, bn_ref, coef_ref, bt_ref, ct_ref, w_ref,
                         bias_ref, o_ref, *, mxu_dtype):
    Bt, L, H = x_ref.shape
    P2 = coef_ref.shape[1]                     # 2 * ssm_size (real || imag lanes)
    rows = Bt * L

    mean = bn_ref[0:1, :]
    invstd = bn_ref[1:2, :]
    dvec = bn_ref[2:3, :]

    # (Bt, L, H) -> (Bt*L, H): leading-dim merge, lane dim unchanged.
    xn = (x_ref[...].reshape(rows, H) - mean) * invstd     # BatchNorm (train stats)
    du = xn * dvec                                          # D*u, consumed post-scan

    # Bu = xn @ [B_real.T | B_img.T]  -> (rows, 2P) = [re | im]   (one MXU dot)
    bu = jnp.dot(xn.astype(mxu_dtype), bt_ref[...],
                 preferred_element_type=jnp.float32)

    # Per-channel 2x2 transition, tiled to width 2P so one multiply covers both
    # real and imag halves (M is real and identical for both).
    mA = coef_ref[0:1, :]
    mB = coef_ref[1:2, :]
    mC = coef_ref[2:3, :]
    mD = coef_ref[3:4, :]
    b1 = coef_ref[4:5, :] * bu                 # F1 forcing -> x1 state (packed)
    b2 = coef_ref[5:6, :] * bu                 # F2 forcing -> x2 state (packed)

    # Local timestep of every flattened row (iota along L, leading-dim merge).
    tloc = lax.broadcasted_iota(jnp.int32, (Bt, L, P2), 1).reshape(rows, P2)

    # Log-depth (Hillis–Steele) prefix scan of s_t = M s_{t-1} + F_t with a
    # constant per-channel M: round r adds M^(2^r) applied to the state shifted
    # by 2^r rows.  The shift is an XLU sublane roll; rows whose source would
    # cross a sequence boundary (tloc < dist) are masked to zero.
    dist = 1
    while dist < L:                            # static: ceil(log2(L)) rounds
        keep = (tloc >= dist).astype(jnp.float32)
        sh1 = pltpu.roll(b1, shift=dist, axis=0) * keep
        sh2 = pltpu.roll(b2, shift=dist, axis=0) * keep
        b1 = b1 + mA * sh1 + mB * sh2
        b2 = b2 + mC * sh1 + mD * sh2
        mA, mB, mC, mD = (mA * mA + mB * mC, mA * mB + mB * mD,
                          mC * mA + mD * mC, mC * mB + mD * mD)
        dist *= 2

    # output = Re(ys @ C.T) = [x2_re | x2_im] @ [C_real.T ; -C_img.T]  (one dot)
    y = jnp.dot(b2.astype(mxu_dtype), ct_ref[...],
                preferred_element_type=jnp.float32)
    g = _gelu_exact(y + du)                    # dropout = identity (eval)

    # GLU via one fused (H, 2H) dot, then split + gate.  Residual is added on
    # the 3-D view so x is re-read at its point of use (never held live).
    h = jnp.dot(g.astype(mxu_dtype), w_ref[...],
                preferred_element_type=jnp.float32) + bias_ref[...]
    glu = h[:, :H] * jax.nn.sigmoid(h[:, H:])
    o_ref[...] = (glu.reshape(Bt, L, H) + x_ref[...]).astype(o_ref.dtype)


# ------------------------------- wrapper --------------------------------------

def _transition_coeffs(params, discretization):
    A = jax.nn.relu(params["A_diag"])
    step = jax.nn.sigmoid(params["steps"])
    if discretization == "IM":
        schur = 1.0 / (1.0 + step ** 2 * A)
        m11 = 1.0 - step ** 2 * A * schur
        m12 = -step * A * schur
        m21 = step * schur
        m22 = schur
        f1s = step * m11
        f2s = step * m21
    elif discretization == "IMEX":
        m11 = jnp.ones_like(A)
        m12 = -step * A
        m21 = step
        m22 = 1.0 - step ** 2 * A
        f1s = step
        f2s = step
    else:
        raise NotImplementedError(discretization)
    return m11, m12, m21, m22, f1s, f2s


def _pick_bt(B, L, H, max_rows=2048):
    """Batch-chunk size: prefer an even grid of >= 4 steps (two v7x TensorCores
    x >= 2 pipelined steps each), then a grid of >= 2, while capping the
    (Bt*L, H) row tile so blocks stay comfortably inside VMEM."""
    cap = max(1, min(B, max(1, max_rows // max(L, 1))))
    divisors = [d for d in range(1, cap + 1) if B % d == 0]
    for want in (4, 2):
        good = [d for d in divisors if (B // d) >= want and (B // d) % 2 == 0]
        if good:
            return max(good)
    return max(divisors)


@functools.partial(jax.jit, static_argnames=("discretization", "mxu_dtype"))
def linoss_block_forward(x, params, discretization="IM", mxu_dtype=jnp.bfloat16):
    B, L, H = x.shape
    P = params["A_diag"].shape[0]
    x = x.astype(jnp.float32)

    # BatchNorm1d(H, affine=False), training-mode biased batch stats.
    # Two-pass mean/var (no E[x^2]-E[x]^2 cancellation), all in f32.
    eps = 1e-5
    mean = jnp.mean(x, axis=(0, 1))
    var = jnp.mean(jnp.square(x - mean), axis=(0, 1))
    bn = jnp.stack([mean, lax.rsqrt(var + eps),
                    params["D"].astype(jnp.float32)], axis=0)            # (3, H)

    # 2x2 transition + forcing scales, tiled to the real||imag packed width 2P.
    m11, m12, m21, m22, f1s, f2s = _transition_coeffs(params, discretization)
    tile2 = lambda v: jnp.concatenate([v, v])
    coef = jnp.stack([tile2(m11), tile2(m12), tile2(m21), tile2(m22),
                      tile2(f1s), tile2(f2s)], axis=0).astype(jnp.float32)  # (6, 2P)

    # Fused MXU weights: B -> (H, 2P), C -> (2P, H), GLU -> (H, 2H).
    bt_f = jnp.concatenate([params["B_real"].T, params["B_img"].T], axis=1)
    ct_f = jnp.concatenate([params["C_real"].T, -params["C_img"].T], axis=0)
    w_f = jnp.concatenate([params["W1"].T, params["W2"].T], axis=1)
    b_f = jnp.concatenate([params["b1"], params["b2"]]).reshape(1, 2 * H)

    Bt = _pick_bt(B, L, H)
    grid = B // Bt

    # VMEM budget: double-buffered x/out blocks + (double-buffered) weights +
    # headroom for the scan's live f32 values; clamped <= 48 MiB for v7x.
    f32b = 4
    block_bytes = Bt * L * H * f32b
    w_bytes = (bt_f.size + ct_f.size + w_f.size) * jnp.dtype(mxu_dtype).itemsize
    live_bytes = Bt * L * (8 * P + 6 * H) * f32b
    vmem_bytes = int(min(48 * 2 ** 20,
                         max(16 * 2 ** 20,
                             4 * block_bytes + 2 * w_bytes + live_bytes + (2 << 20))))

    const = lambda b: (0, 0)        # constant block index -> never re-DMA'd
    kernel = functools.partial(_linoss_block_kernel, mxu_dtype=mxu_dtype)
    out = pl.pallas_call(
        kernel,
        out_shape=jax.ShapeDtypeStruct((B, L, H), jnp.float32),
        grid_spec=pltpu.PrefetchScalarGridSpec(
            num_scalar_prefetch=0,
            grid=(grid,),
            in_specs=[
                pl.BlockSpec((Bt, L, H), lambda b: (b, 0, 0)),   # x
                pl.BlockSpec((3, H), const),                     # mean / invstd / D
                pl.BlockSpec((6, 2 * P), const),                 # transition + forcing
                pl.BlockSpec((H, 2 * P), const),                 # [B_real.T | B_img.T]
                pl.BlockSpec((2 * P, H), const),                 # [C_real.T ; -C_img.T]
                pl.BlockSpec((H, 2 * H), const),                 # [W1.T | W2.T]
                pl.BlockSpec((1, 2 * H), const),                 # [b1 | b2]
            ],
            out_specs=pl.BlockSpec((Bt, L, H), lambda b: (b, 0, 0)),
        ),
        compiler_params=pltpu.CompilerParams(
            dimension_semantics=("parallel",),
            vmem_limit_bytes=vmem_bytes,
        ),
    )(
        x, bn, coef,
        bt_f.astype(mxu_dtype), ct_f.astype(mxu_dtype), w_f.astype(mxu_dtype),
        b_f.astype(jnp.float32),
    )
    return out


# ---------------------------- pure-JAX reference ------------------------------

def linoss_block_ref(x, params, discretization="IM"):
    B, L, H = x.shape
    P = params["A_diag"].shape[0]
    eps = 1e-5
    mean = jnp.mean(x, axis=(0, 1))
    var = jnp.mean((x - mean) ** 2, axis=(0, 1))
    xn = (x - mean) / jnp.sqrt(var + eps)

    m11, m12, m21, m22, f1s, f2s = _transition_coeffs(params, discretization)

    def ssm_one(xb):                       # xb: (L, H)
        bur = xb @ params["B_real"].T
        bui = xb @ params["B_img"].T
        f1r, f2r = f1s * bur, f2s * bur
        f1i, f2i = f1s * bui, f2s * bui

        def stepf(carry, f):
            x1r, x2r, x1i, x2i = carry
            a, b, c, d = f
            nx1r = m11 * x1r + m12 * x2r + a
            nx2r = m21 * x1r + m22 * x2r + b
            nx1i = m11 * x1i + m12 * x2i + c
            nx2i = m21 * x1i + m22 * x2i + d
            return (nx1r, nx2r, nx1i, nx2i), (nx2r, nx2i)

        z = jnp.zeros((P,), jnp.float32)
        _, (ysr, ysi) = lax.scan(stepf, (z, z, z, z), (f1r, f2r, f1i, f2i))
        y = ysr @ params["C_real"].T - ysi @ params["C_img"].T
        return y + xb * params["D"]

    ys = jax.vmap(ssm_one)(xn)
    g = _gelu_exact(ys)
    h1 = g @ params["W1"].T + params["b1"]
    h2 = g @ params["W2"].T + params["b2"]
    return h1 * jax.nn.sigmoid(h2) + x


# ---------------------------------- main --------------------------------------

def init_params(key, P, H):
    ks = jax.random.split(key, 12)
    u = lambda k, shape, lo, hi: jax.random.uniform(k, shape, jnp.float32, lo, hi)
    sH, sP = 1.0 / math.sqrt(H), 1.0 / math.sqrt(P)
    return {
        "A_diag": u(ks[0], (P,), 0.0, 1.0),
        "B_real": u(ks[1], (P, H), -sH, sH),
        "B_img":  u(ks[2], (P, H), -sH, sH),
        "C_real": u(ks[3], (H, P), -sP, sP),
        "C_img":  u(ks[4], (H, P), -sP, sP),
        "D":      u(ks[5], (H,), 0.0, 1.0),
        "steps":  u(ks[6], (P,), 0.0, 1.0),
        "W1":     u(ks[7], (H, H), -sH, sH),
        "b1":     u(ks[8], (H,), -sH, sH),
        "W2":     u(ks[9], (H, H), -sH, sH),
        "b2":     u(ks[10], (H,), -sH, sH),
    }


if __name__ == "__main__":
    B, L, H, P = 8, 16, 32, 16   # batch, seq_len, hidden_dim, ssm_size
    key = jax.random.PRNGKey(0)
    kx, kp = jax.random.split(key)
    x = jax.random.normal(kx, (B, L, H), dtype=jnp.float32)
    params = init_params(kp, P, H)

    # f32-MXU-operand path against the sequential-scan reference.
    for disc in ("IM", "IMEX"):
        out = jax.block_until_ready(
            linoss_block_forward(x, params, discretization=disc,
                                 mxu_dtype=jnp.float32))
        ref = jax.block_until_ready(linoss_block_ref(x, params, discretization=disc))
        np.testing.assert_allclose(np.asarray(out), np.asarray(ref),
                                   rtol=5e-3, atol=5e-3)

    # Default bf16-MXU-operand path (recommended on v5e/v6e/v7x); loose
    # tolerance since the reference keeps everything in f32.
    out_bf16 = jax.block_until_ready(linoss_block_forward(x, params,
                                                          discretization="IM"))
    ref = jax.block_until_ready(linoss_block_ref(x, params, discretization="IM"))
    np.testing.assert_allclose(np.asarray(out_bf16), np.asarray(ref),
                               rtol=1e-1, atol=1e-1)

    print("KERNEL_OK")
</pallas_src>

<mosaic_0001>
module attributes {stable_mosaic.version = 11 : i64} {
  func.func @_linoss_block_kernel(%arg0: i32, %arg1: memref<2x16x32xf32, #tpu.memory_space<vmem>>, %arg2: memref<3x32xf32, #tpu.memory_space<vmem>>, %arg3: memref<6x32xf32, #tpu.memory_space<vmem>>, %arg4: memref<32x32xf32, #tpu.memory_space<vmem>>, %arg5: memref<32x32xf32, #tpu.memory_space<vmem>>, %arg6: memref<32x64xf32, #tpu.memory_space<vmem>>, %arg7: memref<1x64xf32, #tpu.memory_space<vmem>>, %arg8: memref<2x16x32xf32, #tpu.memory_space<vmem>>) attributes {dimension_semantics = [#tpu.dimension_semantics<parallel>], iteration_bounds = array<i64: 4>, scalar_prefetch = 0 : i64, scratch_operands = 0 : i64, tpu.core_type = #tpu.core_type<tc>, window_params = [{transform_indices = @transform_0, window_bounds = array<i64: 2, 16, 32>}, {pipeline_mode = #tpu.pipeline_mode<synchronous>, transform_indices = @transform_1, window_bounds = array<i64: 3, 32>}, {pipeline_mode = #tpu.pipeline_mode<synchronous>, transform_indices = @transform_2, window_bounds = array<i64: 6, 32>}, {pipeline_mode = #tpu.pipeline_mode<synchronous>, transform_indices = @transform_3, window_bounds = array<i64: 32, 32>}, {pipeline_mode = #tpu.pipeline_mode<synchronous>, transform_indices = @transform_4, window_bounds = array<i64: 32, 32>}, {pipeline_mode = #tpu.pipeline_mode<synchronous>, transform_indices = @transform_5, window_bounds = array<i64: 32, 64>}, {pipeline_mode = #tpu.pipeline_mode<synchronous>, transform_indices = @transform_6, window_bounds = array<i64: 1, 64>}, {transform_indices = @transform_7, window_bounds = array<i64: 2, 16, 32>}]} {
    %c0 = arith.constant 0 : index
    %c0_0 = arith.constant 0 : index
    %0 = vector.load %arg2[%c0, %c0_0] : memref<3x32xf32, #tpu.memory_space<vmem>>, vector<1x32xf32>
    %c1 = arith.constant 1 : index
    %c0_1 = arith.constant 0 : index
    %1 = vector.load %arg2[%c1, %c0_1] : memref<3x32xf32, #tpu.memory_space<vmem>>, vector<1x32xf32>
    %c2 = arith.constant 2 : index
    %c0_2 = arith.constant 0 : index
    %2 = vector.load %arg2[%c2, %c0_2] : memref<3x32xf32, #tpu.memory_space<vmem>>, vector<1x32xf32>
    %c0_3 = arith.constant 0 : index
    %c0_4 = arith.constant 0 : index
    %c0_5 = arith.constant 0 : index
    %3 = vector.load %arg1[%c0_3, %c0_4, %c0_5] : memref<2x16x32xf32, #tpu.memory_space<vmem>>, vector<2x16x32xf32>
    %4 = vector.shape_cast %3 : vector<2x16x32xf32> to vector<32x32xf32>
    %5 = vector.broadcast %0 : vector<1x32xf32> to vector<32x32xf32>
    %6 = arith.subf %4, %5 : vector<32x32xf32>
    %7 = vector.broadcast %1 : vector<1x32xf32> to vector<32x32xf32>
    %8 = arith.mulf %6, %7 : vector<32x32xf32>
    %9 = vector.broadcast %2 : vector<1x32xf32> to vector<32x32xf32>
    %10 = arith.mulf %8, %9 : vector<32x32xf32>
    %c0_6 = arith.constant 0 : index
    %c0_7 = arith.constant 0 : index
    %11 = vector.load %arg4[%c0_6, %c0_7] : memref<32x32xf32, #tpu.memory_space<vmem>>, vector<32x32xf32>
    %cst = arith.constant dense<0.000000e+00> : vector<32x32xf32>
    %12 = tpu.matmul %8, %11, %cst {dimension_numbers = #tpu.dot_dimension_numbers<[1], [0], [0], [1], [0, 0, 1, 1], [], []>} : vector<32x32xf32>, vector<32x32xf32>, vector<32x32xf32> -> vector<32x32xf32>
    %c0_8 = arith.constant 0 : index
    %c0_9 = arith.constant 0 : index
    %13 = vector.load %arg3[%c0_8, %c0_9] : memref<6x32xf32, #tpu.memory_space<vmem>>, vector<1x32xf32>
    %c1_10 = arith.constant 1 : index
    %c0_11 = arith.constant 0 : index
    %14 = vector.load %arg3[%c1_10, %c0_11] : memref<6x32xf32, #tpu.memory_space<vmem>>, vector<1x32xf32>
    %c2_12 = arith.constant 2 : index
    %c0_13 = arith.constant 0 : index
    %15 = vector.load %arg3[%c2_12, %c0_13] : memref<6x32xf32, #tpu.memory_space<vmem>>, vector<1x32xf32>
    %c3 = arith.constant 3 : index
    %c0_14 = arith.constant 0 : index
    %16 = vector.load %arg3[%c3, %c0_14] : memref<6x32xf32, #tpu.memory_space<vmem>>, vector<1x32xf32>
    %c4 = arith.constant 4 : index
    %c0_15 = arith.constant 0 : index
    %17 = vector.load %arg3[%c4, %c0_15] : memref<6x32xf32, #tpu.memory_space<vmem>>, vector<1x32xf32>
    %18 = vector.broadcast %17 : vector<1x32xf32> to vector<32x32xf32>
    %19 = arith.mulf %18, %12 : vector<32x32xf32>
    %c5 = arith.constant 5 : index
    %c0_16 = arith.constant 0 : index
    %20 = vector.load %arg3[%c5, %c0_16] : memref<6x32xf32, #tpu.memory_space<vmem>>, vector<1x32xf32>
    %21 = vector.broadcast %20 : vector<1x32xf32> to vector<32x32xf32>
    %22 = arith.mulf %21, %12 : vector<32x32xf32>
    %23 = tpu.iota {dimensions = array<i32: 1>} : vector<2x16x32xi32>
    %24 = vector.shape_cast %23 : vector<2x16x32xi32> to vector<32x32xi32>
    %c1_i32 = arith.constant 1 : i32
    %25 = vector.broadcast %c1_i32 : i32 to vector<32x32xi32>
    %26 = arith.cmpi sge, %24, %25 : vector<32x32xi32>
    %27 = arith.extui %26 : vector<32x32xi1> to vector<32x32xi32>
    %28 = arith.sitofp %27 : vector<32x32xi32> to vector<32x32xf32>
    %c1_i32_17 = arith.constant 1 : i32
    %29 = tpu.dynamic_rotate %19 by %c1_i32_17 dim 0 : vector<32x32xf32>, i32 -> vector<32x32xf32>
    %30 = arith.mulf %29, %28 : vector<32x32xf32>
    %c1_i32_18 = arith.constant 1 : i32
    %31 = tpu.dynamic_rotate %22 by %c1_i32_18 dim 0 : vector<32x32xf32>, i32 -> vector<32x32xf32>
    %32 = arith.mulf %31, %28 : vector<32x32xf32>
    %33 = vector.broadcast %13 : vector<1x32xf32> to vector<32x32xf32>
    %34 = arith.mulf %33, %30 : vector<32x32xf32>
    %35 = arith.addf %19, %34 : vector<32x32xf32>
    %36 = vector.broadcast %14 : vector<1x32xf32> to vector<32x32xf32>
    %37 = arith.mulf %36, %32 : vector<32x32xf32>
    %38 = arith.addf %35, %37 : vector<32x32xf32>
    %39 = vector.broadcast %15 : vector<1x32xf32> to vector<32x32xf32>
    %40 = arith.mulf %39, %30 : vector<32x32xf32>
    %41 = arith.addf %22, %40 : vector<32x32xf32>
    %42 = vector.broadcast %16 : vector<1x32xf32> to vector<32x32xf32>
    %43 = arith.mulf %42, %32 : vector<32x32xf32>
    %44 = arith.addf %41, %43 : vector<32x32xf32>
    %45 = arith.mulf %13, %13 : vector<1x32xf32>
    %46 = arith.mulf %14, %15 : vector<1x32xf32>
    %47 = arith.addf %45, %46 : vector<1x32xf32>
    %48 = arith.mulf %13, %14 : vector<1x32xf32>
    %49 = arith.mulf %14, %16 : vector<1x32xf32>
    %50 = arith.addf %48, %49 : vector<1x32xf32>
    %51 = arith.mulf %15, %13 : vector<1x32xf32>
    %52 = arith.mulf %16, %15 : vector<1x32xf32>
    %53 = arith.addf %51, %52 : vector<1x32xf32>
    %54 = arith.mulf %15, %14 : vector<1x32xf32>
    %55 = arith.mulf %16, %16 : vector<1x32xf32>
    %56 = arith.addf %54, %55 : vector<1x32xf32>
    %c2_i32 = arith.constant 2 : i32
    %57 = vector.broadcast %c2_i32 : i32 to vector<32x32xi32>
    %58 = arith.cmpi sge, %24, %57 : vector<32x32xi32>
    %59 = arith.extui %58 : vector<32x32xi1> to vector<32x32xi32>
    %60 = arith.sitofp %59 : vector<32x32xi32> to vector<32x32xf32>
    %c2_i32_19 = arith.constant 2 : i32
    %61 = tpu.dynamic_rotate %38 by %c2_i32_19 dim 0 : vector<32x32xf32>, i32 -> vector<32x32xf32>
    %62 = arith.mulf %61, %60 : vector<32x32xf32>
    %c2_i32_20 = arith.constant 2 : i32
    %63 = tpu.dynamic_rotate %44 by %c2_i32_20 dim 0 : vector<32x32xf32>, i32 -> vector<32x32xf32>
    %64 = arith.mulf %63, %60 : vector<32x32xf32>
    %65 = vector.broadcast %47 : vector<1x32xf32> to vector<32x32xf32>
    %66 = arith.mulf %65, %62 : vector<32x32xf32>
    %67 = arith.addf %38, %66 : vector<32x32xf32>
    %68 = vector.broadcast %50 : vector<1x32xf32> to vector<32x32xf32>
    %69 = arith.mulf %68, %64 : vector<32x32xf32>
    %70 = arith.addf %67, %69 : vector<32x32xf32>
    %71 = vector.broadcast %53 : vector<1x32xf32> to vector<32x32xf32>
    %72 = arith.mulf %71, %62 : vector<32x32xf32>
    %73 = arith.addf %44, %72 : vector<32x32xf32>
    %74 = vector.broadcast %56 : vector<1x32xf32> to vector<32x32xf32>
    %75 = arith.mulf %74, %64 : vector<32x32xf32>
    %76 = arith.addf %73, %75 : vector<32x32xf32>
    %77 = arith.mulf %47, %47 : vector<1x32xf32>
    %78 = arith.mulf %50, %53 : vector<1x32xf32>
    %79 = arith.addf %77, %78 : vector<1x32xf32>
    %80 = arith.mulf %47, %50 : vector<1x32xf32>
    %81 = arith.mulf %50, %56 : vector<1x32xf32>
    %82 = arith.addf %80, %81 : vector<1x32xf32>
    %83 = arith.mulf %53, %47 : vector<1x32xf32>
    %84 = arith.mulf %56, %53 : vector<1x32xf32>
    %85 = arith.addf %83, %84 : vector<1x32xf32>
    %86 = arith.mulf %53, %50 : vector<1x32xf32>
    %87 = arith.mulf %56, %56 : vector<1x32xf32>
    %88 = arith.addf %86, %87 : vector<1x32xf32>
    %c4_i32 = arith.constant 4 : i32
    %89 = vector.broadcast %c4_i32 : i32 to vector<32x32xi32>
    %90 = arith.cmpi sge, %24, %89 : vector<32x32xi32>
    %91 = arith.extui %90 : vector<32x32xi1> to vector<32x32xi32>
    %92 = arith.sitofp %91 : vector<32x32xi32> to vector<32x32xf32>
    %c4_i32_21 = arith.constant 4 : i32
    %93 = tpu.dynamic_rotate %70 by %c4_i32_21 dim 0 : vector<32x32xf32>, i32 -> vector<32x32xf32>
    %94 = arith.mulf %93, %92 : vector<32x32xf32>
    %c4_i32_22 = arith.constant 4 : i32
    %95 = tpu.dynamic_rotate %76 by %c4_i32_22 dim 0 : vector<32x32xf32>, i32 -> vector<32x32xf32>
    %96 = arith.mulf %95, %92 : vector<32x32xf32>
    %97 = vector.broadcast %79 : vector<1x32xf32> to vector<32x32xf32>
    %98 = arith.mulf %97, %94 : vector<32x32xf32>
    %99 = arith.addf %70, %98 : vector<32x32xf32>
    %100 = vector.broadcast %82 : vector<1x32xf32> to vector<32x32xf32>
    %101 = arith.mulf %100, %96 : vector<32x32xf32>
    %102 = arith.addf %99, %101 : vector<32x32xf32>
    %103 = vector.broadcast %85 : vector<1x32xf32> to vector<32x32xf32>
    %104 = arith.mulf %103, %94 : vector<32x32xf32>
    %105 = arith.addf %76, %104 : vector<32x32xf32>
    %106 = vector.broadcast %88 : vector<1x32xf32> to vector<32x32xf32>
    %107 = arith.mulf %106, %96 : vector<32x32xf32>
    %108 = arith.addf %105, %107 : vector<32x32xf32>
    %109 = arith.mulf %85, %79 : vector<1x32xf32>
    %110 = arith.mulf %88, %85 : vector<1x32xf32>
    %111 = arith.addf %109, %110 : vector<1x32xf32>
    %112 = arith.mulf %85, %82 : vector<1x32xf32>
    %113 = arith.mulf %88, %88 : vector<1x32xf32>
    %114 = arith.addf %112, %113 : vector<1x32xf32>
    %c8_i32 = arith.constant 8 : i32
    %115 = vector.broadcast %c8_i32 : i32 to vector<32x32xi32>
    %116 = arith.cmpi sge, %24, %115 : vector<32x32xi32>
    %117 = arith.extui %116 : vector<32x32xi1> to vector<32x32xi32>
    %118 = arith.sitofp %117 : vector<32x32xi32> to vector<32x32xf32>
    %c8_i32_23 = arith.constant 8 : i32
    %119 = tpu.dynamic_rotate %102 by %c8_i32_23 dim 0 : vector<32x32xf32>, i32 -> vector<32x32xf32>
    %120 = arith.mulf %119, %118 : vector<32x32xf32>
    %c8_i32_24 = arith.constant 8 : i32
    %121 = tpu.dynamic_rotate %108 by %c8_i32_24 dim 0 : vector<32x32xf32>, i32 -> vector<32x32xf32>
    %122 = arith.mulf %121, %118 : vector<32x32xf32>
    %123 = vector.broadcast %111 : vector<1x32xf32> to vector<32x32xf32>
    %124 = arith.mulf %123, %120 : vector<32x32xf32>
    %125 = arith.addf %108, %124 : vector<32x32xf32>
    %126 = vector.broadcast %114 : vector<1x32xf32> to vector<32x32xf32>
    %127 = arith.mulf %126, %122 : vector<32x32xf32>
    %128 = arith.addf %125, %127 : vector<32x32xf32>
    %c0_25 = arith.constant 0 : index
    %c0_26 = arith.constant 0 : index
    %129 = vector.load %arg5[%c0_25, %c0_26] : memref<32x32xf32, #tpu.memory_space<vmem>>, vector<32x32xf32>
    %cst_27 = arith.constant dense<0.000000e+00> : vector<32x32xf32>
    %130 = tpu.matmul %128, %129, %cst_27 {dimension_numbers = #tpu.dot_dimension_numbers<[1], [0], [0], [1], [0, 0, 1, 1], [], []>} : vector<32x32xf32>, vector<32x32xf32>, vector<32x32xf32> -> vector<32x32xf32>
    %131 = arith.addf %130, %10 : vector<32x32xf32>
    %cst_28 = arith.constant 5.000000e-01 : f32
    %132 = vector.broadcast %cst_28 : f32 to vector<32x32xf32>
    %133 = arith.mulf %132, %131 : vector<32x32xf32>
    %cst_29 = arith.constant 0.707106769 : f32
    %134 = vector.broadcast %cst_29 : f32 to vector<32x32xf32>
    %135 = arith.mulf %131, %134 : vector<32x32xf32>
    %136 = math.absf %135 : vector<32x32xf32>
    %cst_30 = arith.constant 0.327591091 : f32
    %137 = vector.broadcast %cst_30 : f32 to vector<32x32xf32>
    %138 = arith.mulf %137, %136 : vector<32x32xf32>
    %cst_31 = arith.constant 1.000000e+00 : f32
    %139 = vector.broadcast %cst_31 : f32 to vector<32x32xf32>
    %140 = arith.addf %139, %138 : vector<32x32xf32>
    %cst_32 = arith.constant 1.000000e+00 : f32
    %141 = vector.broadcast %cst_32 : f32 to vector<32x32xf32>
    %142 = arith.divf %141, %140 : vector<32x32xf32>
    %cst_33 = arith.constant 1.06140542 : f32
    %143 = vector.broadcast %cst_33 : f32 to vector<32x32xf32>
    %144 = arith.mulf %143, %142 : vector<32x32xf32>
    %cst_34 = arith.constant -1.45315206 : f32
    %145 = vector.broadcast %cst_34 : f32 to vector<32x32xf32>
    %146 = arith.addf %144, %145 : vector<32x32xf32>
    %147 = arith.mulf %146, %142 : vector<32x32xf32>
    %cst_35 = arith.constant 1.42141378 : f32
    %148 = vector.broadcast %cst_35 : f32 to vector<32x32xf32>
    %149 = arith.addf %147, %148 : vector<32x32xf32>
    %150 = arith.mulf %149, %142 : vector<32x32xf32>
    %cst_36 = arith.constant -0.284496725 : f32
    %151 = vector.broadcast %cst_36 : f32 to vector<32x32xf32>
    %152 = arith.addf %150, %151 : vector<32x32xf32>
    %153 = arith.mulf %152, %142 : vector<32x32xf32>
    %cst_37 = arith.constant 0.254829586 : f32
    %154 = vector.broadcast %cst_37 : f32 to vector<32x32xf32>
    %155 = arith.addf %153, %154 : vector<32x32xf32>
    %156 = arith.mulf %155, %142 : vector<32x32xf32>
    %cst_38 = arith.constant 0.000000e+00 : f32
    %157 = vector.broadcast %cst_38 : f32 to vector<32x32xf32>
    %158 = arith.subf %157, %136 : vector<32x32xf32>
    %159 = arith.mulf %158, %136 : vector<32x32xf32>
    %160 = math.exp %159 : vector<32x32xf32>
    %161 = arith.mulf %156, %160 : vector<32x32xf32>
    %cst_39 = arith.constant 1.000000e+00 : f32
    %162 = vector.broadcast %cst_39 : f32 to vector<32x32xf32>
    %163 = arith.subf %162, %161 : vector<32x32xf32>
    %cst_40 = arith.constant 0.000000e+00 : f32
    %164 = vector.broadcast %cst_40 : f32 to vector<32x32xf32>
    %165 = arith.cmpf oge, %135, %164 : vector<32x32xf32>
    %cst_41 = arith.constant 0.000000e+00 : f32
    %166 = vector.broadcast %cst_41 : f32 to vector<32x32xf32>
    %167 = arith.subf %166, %163 : vector<32x32xf32>
    %168 = arith.select %165, %163, %167 : vector<32x32xi1>, vector<32x32xf32>
    %cst_42 = arith.constant 1.000000e+00 : f32
    %169 = vector.broadcast %cst_42 : f32 to vector<32x32xf32>
    %170 = arith.addf %169, %168 : vector<32x32xf32>
    %171 = arith.mulf %133, %170 : vector<32x32xf32>
    %c0_43 = arith.constant 0 : index
    %c0_44 = arith.constant 0 : index
    %172 = vector.load %arg6[%c0_43, %c0_44] : memref<32x64xf32, #tpu.memory_space<vmem>>, vector<32x64xf32>
    %cst_45 = arith.constant dense<0.000000e+00> : vector<32x64xf32>
    %173 = tpu.matmul %171, %172, %cst_45 {dimension_numbers = #tpu.dot_dimension_numbers<[1], [0], [0], [1], [0, 0, 1, 1], [], []>} : vector<32x32xf32>, vector<32x64xf32>, vector<32x64xf32> -> vector<32x64xf32>
    %c0_46 = arith.constant 0 : index
    %c0_47 = arith.constant 0 : index
    %174 = vector.load %arg7[%c0_46, %c0_47] : memref<1x64xf32, #tpu.memory_space<vmem>>, vector<1x64xf32>
    %175 = vector.broadcast %174 : vector<1x64xf32> to vector<32x64xf32>
    %176 = arith.addf %173, %175 : vector<32x64xf32>
    %177 = vector.extract_strided_slice %176 {offsets = [0, 0], sizes = [32, 32], strides = [1, 1]} : vector<32x64xf32> to vector<32x32xf32>
    %178 = vector.extract_strided_slice %176 {offsets = [0, 32], sizes = [32, 32], strides = [1, 1]} : vector<32x64xf32> to vector<32x32xf32>
    %179 = arith.negf %178 : vector<32x32xf32>
    %180 = math.exp %179 : vector<32x32xf32>
    %cst_48 = arith.constant 1.000000e+00 : f32
    %181 = vector.broadcast %cst_48 : f32 to vector<32x32xf32>
    %182 = arith.addf %181, %180 : vector<32x32xf32>
    %183 = arith.divf %181, %182 : vector<32x32xf32>
    %184 = arith.mulf %177, %183 : vector<32x32xf32>
    %185 = vector.shape_cast %184 : vector<32x32xf32> to vector<2x16x32xf32>
    %c0_49 = arith.constant 0 : index
    %c0_50 = arith.constant 0 : index
    %c0_51 = arith.constant 0 : index
    %186 = vector.load %arg1[%c0_49, %c0_50, %c0_51] : memref<2x16x32xf32, #tpu.memory_space<vmem>>, vector<2x16x32xf32>
    %187 = arith.addf %185, %186 : vector<2x16x32xf32>
    %c0_52 = arith.constant 0 : index
    %c0_53 = arith.constant 0 : index
    %c0_54 = arith.constant 0 : index
    %188 = vector.load %arg8[%c0_52, %c0_53, %c0_54] : memref<2x16x32xf32, #tpu.memory_space<vmem>>, vector<2x16x32xf32>
    tpu.vector_store %arg8[%c0_52, %c0_53, %c0_54], %187 {strides = array<i32>} : memref<2x16x32xf32, #tpu.memory_space<vmem>>, vector<2x16x32xf32>,
    return
  }
  func.func @transform_0(%arg0: i32) -> (i32, i32, i32) {
    %c0_i32 = arith.constant 0 : i32
    %c0_i32_0 = arith.constant 0 : i32
    %c0_i32_1 = arith.constant 0 : i32
    return %arg0, %c0_i32, %c0_i32_0 : i32, i32, i32
  }
  func.func @transform_1(%arg0: i32) -> (i32, i32) {
    %c0_i32 = arith.constant 0 : i32
    %c0_i32_0 = arith.constant 0 : i32
    %c0_i32_1 = arith.constant 0 : i32
    return %c0_i32, %c0_i32_0 : i32, i32
  }
  func.func @transform_2(%arg0: i32) -> (i32, i32) {
    %c0_i32 = arith.constant 0 : i32
    %c0_i32_0 = arith.constant 0 : i32
    %c0_i32_1 = arith.constant 0 : i32
    return %c0_i32, %c0_i32_0 : i32, i32
  }
  func.func @transform_3(%arg0: i32) -> (i32, i32) {
    %c0_i32 = arith.constant 0 : i32
    %c0_i32_0 = arith.constant 0 : i32
    %c0_i32_1 = arith.constant 0 : i32
    return %c0_i32, %c0_i32_0 : i32, i32
  }
  func.func @transform_4(%arg0: i32) -> (i32, i32) {
    %c0_i32 = arith.constant 0 : i32
    %c0_i32_0 = arith.constant 0 : i32
    %c0_i32_1 = arith.constant 0 : i32
    return %c0_i32, %c0_i32_0 : i32, i32
  }
  func.func @transform_5(%arg0: i32) -> (i32, i32) {
    %c0_i32 = arith.constant 0 : i32
    %c0_i32_0 = arith.constant 0 : i32
    %c0_i32_1 = arith.constant 0 : i32
    return %c0_i32, %c0_i32_0 : i32, i32
  }
  func.func @transform_6(%arg0: i32) -> (i32, i32) {
    %c0_i32 = arith.constant 0 : i32
    %c0_i32_0 = arith.constant 0 : i32
    %c0_i32_1 = arith.constant 0 : i32
    return %c0_i32, %c0_i32_0 : i32, i32
  }
  func.func @transform_7(%arg0: i32) -> (i32, i32, i32) {
    %c0_i32 = arith.constant 0 : i32
    %c0_i32_0 = arith.constant 0 : i32
    %c0_i32_1 = arith.constant 0 : i32
    return %arg0, %c0_i32, %c0_i32_0 : i32, i32, i32
  }
}

</mosaic_0001>

<bundles_post_ra>
// kernel: linoss_block_forward.1
= control target key start
LH: loop header
LB: loop body
LE: loop exit
PB: predicated region body
PF: predicated region fallthrough
CT: control target
= control target key end

     0   :  { %12 = vsyncpa [#allocation3], 0  ;;  %s1945_s0 = inlined_call_operand.vmem [shape: f32[8,16,32], index: 0, kind: input, shape index: {}]   ;;  %s1946_s1 = inlined_call_operand.vmem [shape: f32[3,32], index: 1, kind: input, shape index: {}]   ;;  %s1947_s2 = inlined_call_operand.vmem [shape: f32[6,32], index: 2, kind: input, shape index: {}]   ;;  %s1948_s3 = inlined_call_operand.vmem [shape: f32[32,32], index: 3, kind: input, shape index: {}]   ;;  %s1949_s4 = inlined_call_operand.vmem [shape: f32[32,32], index: 4, kind: input, shape index: {}]   ;;  %s1950_s5 = inlined_call_operand.vmem [shape: f32[32,64], index: 5, kind: input, shape index: {}]   ;;  %s1951_s6 = inlined_call_operand.vmem [shape: f32[1,64], index: 6, kind: input, shape index: {}]   ;;  %s1952_s7 = inlined_call_operand.hbm [shape: f32[8,16,32], index: 7, kind: output, shape index: {}]  }
   0x1   :  { %14 = vsyncpa [#allocation3 + $0x1], 0  ;;  %s1510_s24 = smov 0   ;;  %s1512_s25 = smov 0  }
   0x2   :  { %s1514_s26 = smov 0   ;;  %s1516_s27 = smov 0  }
   0x3 LB: > { %s1531_s28 = sadd.s32 4294967295, %s1463_s27   ;;  %s1190_s29 = sadd.s32 4294967294, %s1463_s27   ;;  %s1463_s27 = sphi %s1516_s27, %s1958_s27   ;;  %s1459_s26 = sphi %s1514_s26, %s1957_s26   ;;  %s1455_s25 = sphi %s1512_s25, %s1956_s25   ;;  %s1451_s24 = sphi %s1510_s24, %s1955_s24  }
   0x4   : > { %s1535_s30 = sadd.s32 1, %s1463_s27   ;;  %s179_s8 = sadd.s32 1, %s1459_s26 }
   0x5   : > { %s176_s9 = ssub.s32 %s1463_s27, %s1535_s30  ;;  %p189_p0 = scmp.ne.s32.totalorder %s1459_s26, %s1455_s25 }
   0x6   : > { %p177_p1 = scmp.eq.s32.totalorder %s176_s9, 0  ;;  %p190_p2 = scmp.eq.s32.totalorder %s1531_s28, 3 }
   0x7   : > { %p195_p3 = scmp.ne.s32.totalorder %s1455_s25, %s1451_s24  ;;  %p196_p4 = scmp.eq.s32.totalorder %s1190_s29, 3 }
   0x8   : > { %s1546_s10 = scalar_select %p177_p1, %s1459_s26, %s179_s8  }
   0x9   : > { %p1548_p5 = por %p190_p2, %p189_p0  ;;  %p1552_p6 = por %p196_p4, %p195_p3 }
   0xa   : > { %p1193_p7 = scmp.ge.s32.totalorder %s1463_s27, 1  ;;  %p242_p8 = scmp.lt.s32.totalorder %s1463_s27, 5 }
   0xc   : > { %p243_p9 = pnand %p1193_p7, %p242_p8 }
   0xd   : > { %v314_v0 = vld [vmem:[%s1948_s3] sm:$0xff] (!%p243_p9)  ;;  %v315_v1 = vld [vmem:[%s1948_s3 + $0x8] sm:$0xff] (!%p243_p9)  ;;  %v316_v2 = vld [vmem:[%s1948_s3 + $0x10] sm:$0xff] (!%p243_p9)  ;;  %s1195_s19 = sshll.u32 (!%p243_p9), %s1531_s28, 1  ;;  %vm318_vm0 = vcmask (!%p243_p9), 261120   ;;  %v438_v26 = vlaneseq (!%p243_p9)  ;;  %v1465_v58 = vmov (!%p243_p9), 0.0  }
   0xe   : > { %246 = sbr.rel (%p243_p9) target bundleno = 940 (0x3ac), region = 48  ;;  %v1298_v3 = vpack.c.bf16 (!%p243_p9), %v315_v1, %v314_v0  ;;  %v317_v4 = vld [vmem:[%s1948_s3 + $0x18] sm:$0xff] (!%p243_p9)  ;;  %p276_p10 = scmp.lt.s32.totalorder (!%p243_p9), %s1195_s19, 7  ;;  %v1198_v6 = vld [vmem:[%s1946_s1] ss:$0 sm:$0xff] (!%p243_p9)  ;;  %v745_v21 = vld [vmem:[%s1949_s4 + $0x8] sm:$0xff] (!%p243_p9) }
   0xf   : > { %v1302_v5 = vpack.c.bf16 (!%p243_p9), %v317_v4, %v316_v2  ;;  %v1199_v7 = vld [vmem:[%s1946_s1 + $0x1] ss:$0 sm:$0xff] (!%p243_p9)  ;;  %v746_v22 = vld [vmem:[%s1949_s4 + $0x10] sm:$0xff] (!%p243_p9)  ;;  %v747_v24 = vld [vmem:[%s1949_s4 + $0x18] sm:$0xff] (!%p243_p9)  ;;  %v1632_v37 = vshrl.u32 (!%p243_p9), %v438_v26, 7  ;;  %s1466_s20 = smov (!%p243_p9), 96  }
  0x10   : > { %1299 = vmatprep.subr.bf16.mxu0 (!%p243_p9), %v1298_v3  ;;  %v744_v20 = vld [vmem:[%s1949_s4] sm:$0xff] (!%p243_p9)  ;;  %v1310_v25 = vpack.c.bf16 (!%p243_p9), %v747_v24, %v746_v22  ;;  %s272_s21 = sand.u32 (!%p243_p9), 1, %s1455_s25   ;;  %s1231_s8 = sshll.u32 (!%p243_p9), %s1531_s28, 9 }
  0x11   : > { %1301 = vmatpush3.bf16.msra.mxu0 (!%p243_p9), %v1298_v3  ;;  %v1306_v23 = vpack.c.bf16 (!%p243_p9), %v745_v21, %v744_v20  ;;  %v416_v27 = vld [vmem:[%s1947_s2] sm:$0x1] (!%p243_p9)  ;;  %v417_v28 = vld [vmem:[%s1947_s2 + $0x1] sm:$0x1] (!%p243_p9)  ;;  %v418_v29 = vld [vmem:[%s1947_s2 + $0x2] sm:$0x1] (!%p243_p9)  ;;  %s1898_s14 = scalar_lea.hbm (!%p243_p9), %s1952_s7, %s1231_s8 }
  0x12   : > { %1303 = vmatprep.subr.bf16.mxu0 (!%p243_p9), %v1302_v5  ;;  %v419_v30 = vld [vmem:[%s1947_s2 + $0x3] sm:$0x1] (!%p243_p9)  ;;  %v520_v31 = vmul.f32 (!%p243_p9), %v416_v27, %v416_v27  ;;  %v521_v32 = vmul.f32 (!%p243_p9), %v418_v29, %v417_v28  ;;  %v523_v33 = vmul.f32 (!%p243_p9), %v417_v28, %v416_v27  ;;  %v526_v35 = vmul.f32 (!%p243_p9), %v418_v29, %v416_v27  ;;  %v1205_v52 = vld [vmem:[%s1947_s2 + $0x4] ss:$0 sm:$0xff] (!%p243_p9)  ;;  %v1206_v53 = vld [vmem:[%s1947_s2 + $0x5] ss:$0 sm:$0xff] (!%p243_p9) }
  0x13   : > { %1307 = vmatprep.subr.bf16.mxu1 (!%p243_p9), %v1306_v23  ;;  %v524_v34 = vmul.f32 (!%p243_p9), %v419_v30, %v417_v28  ;;  %v527_v36 = vmul.f32 (!%p243_p9), %v419_v30, %v418_v29  ;;  %v529_v38 = vmul.f32 (!%p243_p9), %v419_v30, %v419_v30  ;;  %v1635_v42 = vsub.s32 (!%p243_p9), 0, %v1632_v37  ;;  %s1904_s28 = scalar_lea.sflag (!%p243_p9), [#allocation3], %s272_s21  ;;  %s1467_s16 = smov (!%p243_p9), [#allocation2]  }
  0x14   : > { %1309 = vmatpush3.bf16.msra.mxu1 (!%p243_p9), %v1306_v23  ;;  %v522_v40 = vadd.f32 (!%p243_p9), %v521_v32, %v520_v31  ;;  %vm441_vm1 = vcmp.ge.s32.totalorder (!%p243_p9), %v1632_v37, 1  ;;  %vm531_vm2 = vcmp.ge.s32.totalorder (!%p243_p9), %v1632_v37, 2  ;;  %vm451_vm3 = vcmp.lt.s32.totalorder (!%p243_p9), %v1632_v37, 1  ;;  %s1405_s17 = sshll.u32 (!%p243_p9), %s1467_s16, 4  ;;  %s1406_s17 = int_to_ptr.vmem [resolvable:$false] %s1405_s17 }
  0x15   : > { %s1960_s19 = smov (!%p276_p10, %s1195_s19), 7  ;;  %1305 = vmatpush3.bf16.msra.mxu0 %v1302_v5  ;;  %1311 = vmatprep.subr.bf16.mxu1 %v1310_v25  ;;  %v525_v39 = vadd.f32 %v524_v34, %v523_v33  ;;  %v528_v41 = vadd.f32 %v527_v36, %v526_v35  ;;  %v530_v43 = vadd.f32 %v529_v38, %v521_v32  ;;  %v1660_v59 = vsel %vm441_vm1, 1.0, %v1465_v58  ;;  %s1407_s18 = scalar_lea.vmem %s1406_s17, 1024 }
  0x16   : > { %s1229_s22 = sshll.u32 %s1960_s19, 4  ;;  %v610_v44 = vmul.f32 %v522_v40, %v522_v40  ;;  %v1641_v50 = vrot.slane %v416_v27, %v1635_v42  ;;  %v1650_v54 = vrot.slane %v417_v28, %v1635_v42  ;;  %v1653_v55 = vrot.slane %v418_v29, %v1635_v42 }
  0x17   : > { %s280_s13 = scalar_lea.vmem %s1945_s0, %s1229_s22  ;;  %v611_v45 = vmul.f32 %v528_v41, %v525_v39  ;;  %v616_v46 = vmul.f32 %v528_v41, %v522_v40  ;;  %v617_v47 = vmul.f32 %v530_v43, %v528_v41  ;;  %v613_v48 = vmul.f32 %v525_v39, %v522_v40  ;;  %s1194_s22 = sshll.u32 %s272_s21, 5 }
  0x18   : > { %v1580_v8 = vld [vmem:[%s280_s13] sm:$0xff]  ;;  %v1582_v9 = vld [vmem:[%s280_s13 + $0x8] sm:$0xff]  ;;  %v1584_v10 = vld [vmem:[%s280_s13 + $0x10] sm:$0xff]  ;;  %1313 = vmatpush3.bf16.msra.mxu1 %v1310_v25  ;;  %v614_v49 = vmul.f32 %v530_v43, %v525_v39  ;;  %v619_v51 = vmul.f32 %v530_v43, %v530_v43  ;;  %v1656_v56 = vrot.slane %v419_v30, %v1635_v42  ;;  %v1664_v60 = vsel %vm531_vm2, 1.0, %v1465_v58  ;;  %s274_s23 = scalar_lea.vmem [#allocation2], %s1194_s22 }
  0x19   : > { %v294_v11 = vsub.f32 %v1580_v8, %v1198_v6  ;;  %v295_v12 = vsub.f32 %v1582_v9, %v1198_v6  ;;  %v296_v13 = vsub.f32 %v1584_v10, %v1198_v6  ;;  %v1589_v14 = vld [vmem:[%s280_s13 + $0x18] sm:$0xff]  ;;  %v612_v57 = vadd.f32 %v611_v45, %v610_v44  ;;  %s1128_s29 = sshll.u32 %s274_s23, 4  ;;  %s1900_s29 = int_to_ptr.vmem [resolvable:$true] %s1128_s29 }
  0x1a   : > { %v297_v15 = vsub.f32 %v1589_v14, %v1198_v6  ;;  %v1667_v61 = vrot.slane %v522_v40, %v1635_v42  ;;  %vm621_vm4 = vcmp.ge.s32.totalorder %v1632_v37, 4  ;;  %v1671_v63 = vrot.slane %v525_v39, %v1635_v42  ;;  %s1401_s15 = scalar_lea.vmem %s1900_s29, 512  ;;  %p1408_p0 = scmp.lt.s32.totalorder %s1900_s29, %s1406_s17 }
  0x1b   : > { %v1592_v16 = vmul.f32 %v1199_v7, %v294_v11  ;;  %v1594_v17 = vmul.f32 %v1199_v7, %v295_v12  ;;  %v1596_v18 = vmul.f32 %v1199_v7, %v296_v13  ;;  %v1674_v0 = vrot.slane %v528_v41, %v1635_v42  ;;  %p1402_p11 = scmp.ne.s32.totalorder %s1900_s29, %s1401_s15  ;;  %p1409_p1 = scmp.lt.s32.totalorder %s1407_s18, %s1401_s15 }
  0x1c   : > { %v1602_v19 = vmul.f32 %v1199_v7, %v297_v15  ;;  %v618_v1 = vadd.f32 %v617_v47, %v616_v46  ;;  %v615_v2 = vadd.f32 %v614_v49, %v613_v48  ;;  %v1677_v6 = vrot.slane %v530_v43, %v1635_v42 }
  0x1d   : > { %1264 = vmatprep.mubr.msk.f32.mxu0 %vm318_vm0, %v1592_v16  ;;  %v620_v7 = vadd.f32 %v619_v51, %v611_v45  ;;  %v1679_v13 = vsel %vm621_vm4, 1.0, %v1465_v58  ;;  %v1682_v15 = vrot.slane %v612_v57, %v1635_v42  ;;  %vm541_vm5 = vcmp.lt.s32.totalorder %v1632_v37, 2  ;;  %p1403_p12 = pnand %p1402_p11, %p1548_p5  ;;  %p1410_p2 = por %p1409_p1, %p1408_p0 }
  0x1e   : > { %1265 = vmatmul.mubr.msk.f32.vlgmr.msra.gmra.mrb[0].mxu0 %vm318_vm0, %v1594_v17  ;;  %v700_v22 = vmul.f32 %v618_v1, %v612_v57  ;;  %v1685_v27 = vrot.slane %v618_v1, %v1635_v42  ;;  %v1688_v28 = vrot.slane %v615_v2, %v1635_v42  ;;  %v703_v33 = vmul.f32 %v618_v1, %v615_v2 }
  0x1f   : > { %1267 = vmatprep.mubr.msk.f32.mxu0 %vm318_vm0, %v1596_v18  ;;  %v701_v23 = vmul.f32 %v620_v7, %v618_v1  ;;  %v1691_v32 = vrot.slane %v620_v7, %v1635_v42  ;;  %v704_v43 = vmul.f32 %v620_v7, %v620_v7  ;;  %vm631_vm6 = vcmp.lt.s32.totalorder %v1632_v37, 4  ;;  %p1404_p13 = pneg %p1403_p12 }
  0x21   : > { %v702_v41 = vadd.f32 %v701_v23, %v700_v22  ;;  %p1411_p3 = pnand %p1410_p2, %p1404_p13 }
  0x22   : > { %1268 = vmatmul.mubr.msk.f32.gmra.mrb[2].mxu0 %vm318_vm0, %v1602_v19 }
  0xf1   : > { %v1266_v62 = vpop.f32.mrb[0].mxu0 }
  0xf2   : > { %v426_v3 = vmul.f32 %v1266_v62, %v1205_v52  ;;  %v435_v4 = vmul.f32 %v1266_v62, %v1206_v53  ;;  %v397_v5 = vpop.f32.mrb[1].mxu0 }
  0xf3   : > { %v425_v11 = vmul.f32 %v1205_v52, %v397_v5  ;;  %v434_v12 = vmul.f32 %v1206_v53, %v397_v5 }
  0xf4   : > { %v448_v20 = vrot.slane %v426_v3, 7  ;;  %v461_v21 = vrot.slane %v435_v4, 7 }
  0xf5   : > { %v447_v24 = vrot.slane %v425_v11, 7  ;;  %v460_v25 = vrot.slane %v434_v12, 7  ;;  %v1269_v26 = vpop.f32.mrb[2].mxu0 }
  0xf6   : > { %v428_v29 = vmul.f32 %v1269_v26, %v1205_v52  ;;  %v437_v30 = vmul.f32 %v1269_v26, %v1206_v53  ;;  %v407_v31 = vpop.f32.mrb[3].mxu0  ;;  %v1723_v26 = vrot.slane %v702_v41, %v1635_v42 }
  0xf7   : > { %v454_v34 = vsel %vm451_vm3, %v447_v24, %v448_v20  ;;  %v466_v35 = vsel %vm451_vm3, %v460_v25, %v461_v21  ;;  %v427_v36 = vmul.f32 %v1205_v52, %v407_v31  ;;  %v436_v38 = vmul.f32 %v1206_v53, %v407_v31 }
  0xf8   : > { %v477_v39 = vmul.f32 %v1641_v50, %v454_v34  ;;  %v501_v40 = vmul.f32 %v1653_v55, %v454_v34  ;;  %v450_v44 = vrot.slane %v428_v29, 7  ;;  %v463_v45 = vrot.slane %v437_v30, 7 }
  0xf9   : > { %v449_v46 = vrot.slane %v427_v36, 7  ;;  %v462_v47 = vrot.slane %v436_v38, 7  ;;  %v489_v49 = vmul.f32 %v1650_v54, %v466_v35  ;;  %v513_v57 = vmul.f32 %v1656_v56, %v466_v35 }
  0xfa   : > { %v481_v48 = vadd.f32 %v477_v39, %v426_v3  ;;  %v505_v51 = vadd.f32 %v501_v40, %v435_v4  ;;  %v455_v52 = vsel %vm451_vm3, %v450_v44, %v447_v24  ;;  %v467_v53 = vsel %vm451_vm3, %v463_v45, %v460_v25 }
  0xfb   : > { %v452_v58 = vsel %vm451_vm3, %v449_v46, %v450_v44  ;;  %v453_v62 = vsel %vm451_vm3, %v448_v20, %v449_v46  ;;  %v456_v3 = vmul.f32 %v1660_v59, %v455_v52  ;;  %v468_v4 = vmul.f32 %v1660_v59, %v467_v53 }
  0xfc   : > { %v493_v1 = vadd.f32 %v489_v49, %v481_v48  ;;  %v1710_v2 = vadd.f32 %v513_v57, %v505_v51  ;;  %v458_v5 = vmul.f32 %v1660_v59, %v453_v62  ;;  %v464_v7 = vsel %vm451_vm3, %v462_v47, %v463_v45 }
  0xfd   : > { %v465_v22 = vsel %vm451_vm3, %v461_v21, %v462_v47  ;;  %v479_v23 = vmul.f32 %v1641_v50, %v452_v58  ;;  %v476_v24 = vmul.f32 %v1641_v50, %v456_v3  ;;  %v488_v20 = vmul.f32 %v1650_v54, %v468_v4 }
  0xfe   : > { %v705_v25 = vadd.f32 %v704_v43, %v703_v33  ;;  %v500_v31 = vmul.f32 %v1653_v55, %v456_v3  ;;  %v512_v34 = vmul.f32 %v1656_v56, %v468_v4  ;;  %v470_v35 = vmul.f32 %v1660_v59, %v465_v22 }
  0xff   : > { %v478_v39 = vmul.f32 %v1641_v50, %v458_v5  ;;  %v480_v40 = vadd.f32 %v476_v24, %v425_v11  ;;  %v483_v21 = vadd.f32 %v479_v23, %v428_v29  ;;  %v491_v44 = vmul.f32 %v1650_v54, %v464_v7 }
 0x100   : > { %v502_v45 = vmul.f32 %v1653_v55, %v458_v5  ;;  %v504_v46 = vadd.f32 %v500_v31, %v434_v12  ;;  %v490_v33 = vmul.f32 %v1650_v54, %v470_v35  ;;  %v503_v41 = vmul.f32 %v1653_v55, %v452_v58 }
 0x101   : > { %v482_v47 = vadd.f32 %v478_v39, %v427_v36  ;;  %v492_v43 = vadd.f32 %v488_v20, %v480_v40  ;;  %v495_v48 = vadd.f32 %v491_v44, %v483_v21  ;;  %v514_v51 = vmul.f32 %v1656_v56, %v470_v35 }
 0x102   : > { %v506_v49 = vadd.f32 %v502_v45, %v436_v38  ;;  %v516_v59 = vadd.f32 %v512_v34, %v504_v46  ;;  %v507_v50 = vadd.f32 %v503_v41, %v437_v30  ;;  %v515_v11 = vmul.f32 %v1656_v56, %v464_v7 }
 0x103   : > { %v494_v57 = vadd.f32 %v490_v33, %v482_v47  ;;  %v538_v29 = vrot.slane %v493_v1, 6  ;;  %v537_v52 = vrot.slane %v492_v43, 6  ;;  %v540_v62 = vrot.slane %v495_v48, 6 }
 0x104   : > { %v518_v53 = vadd.f32 %v514_v51, %v506_v49  ;;  %v551_v12 = vrot.slane %v1710_v2, 6  ;;  %v550_v36 = vrot.slane %v516_v59, 6  ;;  %v519_v54 = vadd.f32 %v515_v11, %v507_v50 }
 0x105   : > { %v539_v3 = vrot.slane %v494_v57, 6  ;;  %v544_v55 = vsel %vm541_vm5, %v537_v52, %v538_v29  ;;  %v545_v58 = vsel %vm541_vm5, %v540_v62, %v537_v52  ;;  %v1741_v30 = vrot.slane %v705_v25, %v1635_v42 }
 0x106   : > { %v552_v38 = vrot.slane %v518_v53, 6  ;;  %v556_v56 = vsel %vm541_vm5, %v550_v36, %v551_v12  ;;  %v553_v7 = vrot.slane %v519_v54, 6  ;;  %v567_v42 = vmul.f32 %v1667_v61, %v544_v55 }
 0x107   : > { %v542_v4 = vsel %vm541_vm5, %v539_v3, %v540_v62  ;;  %v543_v5 = vsel %vm541_vm5, %v538_v29, %v539_v3  ;;  %v579_v31 = vmul.f32 %v1671_v63, %v556_v56  ;;  %v546_v51 = vmul.f32 %v1664_v60, %v545_v58 }
 0x108   : > { %v548_v22 = vmul.f32 %v1664_v60, %v543_v5  ;;  %v555_v23 = vsel %vm541_vm5, %v551_v12, %v552_v38  ;;  %v569_v24 = vmul.f32 %v1667_v61, %v542_v4  ;;  %v554_v20 = vsel %vm541_vm5, %v552_v38, %v553_v7 }
 0x109   : > { %v560_v25 = vmul.f32 %v1664_v60, %v555_v23  ;;  %v593_v34 = vmul.f32 %v1674_v0, %v542_v4  ;;  %v571_v39 = vadd.f32 %v567_v42, %v493_v1  ;;  %v581_v21 = vmul.f32 %v1671_v63, %v554_v20 }
 0x10a   : > { %v568_v35 = vmul.f32 %v1667_v61, %v548_v22  ;;  %v573_v40 = vadd.f32 %v569_v24, %v495_v48  ;;  %v592_v45 = vmul.f32 %v1674_v0, %v548_v22  ;;  %v605_v49 = vmul.f32 %v1677_v6, %v554_v20 }
 0x10b   : > { %v580_v44 = vmul.f32 %v1671_v63, %v560_v25  ;;  %v597_v46 = vadd.f32 %v593_v34, %v519_v54  ;;  %v604_v47 = vmul.f32 %v1677_v6, %v560_v25  ;;  %v1765_v41 = vadd.f32 %v579_v31, %v571_v39 }
 0x10c   : > { %v572_v33 = vadd.f32 %v568_v35, %v494_v57  ;;  %v596_v50 = vadd.f32 %v592_v45, %v518_v53  ;;  %v557_v1 = vsel %vm541_vm5, %v553_v7, %v550_v36  ;;  %v585_v48 = vadd.f32 %v581_v21, %v573_v40 }
 0x10d   : > { %v591_v11 = vmul.f32 %v1674_v0, %v544_v55  ;;  %v628_v52 = vrot.slane %v1765_v41, 4  ;;  %v558_v62 = vmul.f32 %v1664_v60, %v557_v1  ;;  %v566_v57 = vmul.f32 %v1667_v61, %v546_v51 }
 0x10e   : > { %v584_v29 = vadd.f32 %v580_v44, %v572_v33  ;;  %v608_v12 = vadd.f32 %v604_v47, %v596_v50  ;;  %v590_v54 = vmul.f32 %v1674_v0, %v546_v51  ;;  %v609_v3 = vadd.f32 %v605_v49, %v597_v46 }
 0x10f   : > { %v630_v38 = vrot.slane %v585_v48, 4  ;;  %v570_v53 = vadd.f32 %v566_v57, %v492_v43  ;;  %v578_v4 = vmul.f32 %v1671_v63, %v558_v62  ;;  %v602_v36 = vmul.f32 %v1677_v6, %v558_v62 }
 0x110   : > { %v629_v58 = vrot.slane %v584_v29, 4  ;;  %v642_v5 = vrot.slane %v608_v12, 4  ;;  %v594_v55 = vadd.f32 %v590_v54, %v516_v59  ;;  %v643_v7 = vrot.slane %v609_v3, 4 }
 0x111   : > { %v595_v22 = vadd.f32 %v591_v11, %v1710_v2  ;;  %v582_v61 = vadd.f32 %v578_v4, %v570_v53  ;;  %v603_v23 = vmul.f32 %v1677_v6, %v556_v56 }
 0x112   : > { %v633_v60 = vsel %vm631_vm6, %v628_v52, %v629_v58  ;;  %v632_v0 = vsel %vm631_vm6, %v629_v58, %v630_v38  ;;  %v606_v42 = vadd.f32 %v602_v36, %v594_v55  ;;  %v644_v63 = vsel %vm631_vm6, %v642_v5, %v643_v7 }
 0x113   : > { %v638_v43 = vmul.f32 %v1679_v13, %v633_v60  ;;  %v659_v59 = vmul.f32 %v1682_v15, %v632_v0  ;;  %v627_v24 = vrot.slane %v582_v61, 4  ;;  %v671_v2 = vmul.f32 %v1688_v28, %v644_v63 }
 0x114   : > { %v683_v20 = vmul.f32 %v1685_v27, %v632_v0  ;;  %v695_v25 = vmul.f32 %v1691_v32, %v644_v63  ;;  %v640_v6 = vrot.slane %v606_v42, 4  ;;  %v607_v40 = vadd.f32 %v603_v23, %v595_v22 }
 0x115   : > { %v658_v31 = vmul.f32 %v1682_v15, %v638_v43  ;;  %v682_v34 = vmul.f32 %v1685_v27, %v638_v43  ;;  %v663_v56 = vadd.f32 %v659_v59, %v585_v48  ;;  %v635_v35 = vsel %vm631_vm6, %v630_v38, %v627_v24 }
 0x116   : > { %v687_v39 = vadd.f32 %v683_v20, %v609_v3  ;;  %v634_v21 = vsel %vm631_vm6, %v627_v24, %v628_v52  ;;  %v636_v46 = vmul.f32 %v1679_v13, %v635_v35  ;;  %v647_v47 = vsel %vm631_vm6, %v643_v7, %v640_v6 }
 0x117   : > { %v662_v44 = vadd.f32 %v658_v31, %v584_v29  ;;  %v686_v45 = vadd.f32 %v682_v34, %v608_v12  ;;  %v648_v33 = vmul.f32 %v1679_v13, %v647_v47  ;;  %v675_v49 = vadd.f32 %v671_v2, %v663_v56 }
 0x118   : > { %v699_v51 = vadd.f32 %v695_v25, %v687_v39  ;;  %v641_v50 = vrot.slane %v607_v40, 4  ;;  %v656_v1 = vmul.f32 %v1682_v15, %v636_v46  ;;  %v680_v48 = vmul.f32 %v1685_v27, %v636_v46  ;;  %v953_v39 = vld [vmem:[%s1950_s5] sm:$0xff] }
 0x119   : > { %v657_v11 = vmul.f32 %v1682_v15, %v634_v21  ;;  %v681_v52 = vmul.f32 %v1685_v27, %v634_v21  ;;  %v668_v29 = vmul.f32 %v1688_v28, %v648_v33  ;;  %v692_v62 = vmul.f32 %v1691_v32, %v648_v33  ;;  %v956_v21 = vld [vmem:[%s1950_s5 + $0x18] sm:$0xff] }
 0x11a   : > { %v712_v57 = vmul.f32 0.0, %v675_v49  ;;  %v716_v12 = vmul.f32 0.0, %v699_v51  ;;  %v684_v54 = vadd.f32 %v680_v48, %v606_v42  ;;  %v646_v3 = vsel %vm631_vm6, %v640_v6, %v641_v50 }
 0x11b   : > { %v660_v38 = vadd.f32 %v656_v1, %v582_v61  ;;  %v685_v58 = vadd.f32 %v681_v52, %v607_v40  ;;  %v669_v4 = vmul.f32 %v1688_v28, %v646_v3  ;;  %v693_v15 = vmul.f32 %v1691_v32, %v646_v3 }
 0x11c   : > { %v724_v53 = vmul.f32 %v1723_v26, %v712_v57  ;;  %v696_v36 = vadd.f32 %v692_v62, %v684_v54  ;;  %v645_v55 = vsel %vm631_vm6, %v641_v50, %v642_v5  ;;  %v661_v7 = vadd.f32 %v657_v11, %v1765_v41 }
 0x11d   : > { %v672_v27 = vadd.f32 %v668_v29, %v660_v38  ;;  %v697_v22 = vadd.f32 %v693_v15, %v685_v58  ;;  %v650_v60 = vmul.f32 %v1679_v13, %v645_v55  ;;  %v736_v61 = vmul.f32 %v1741_v30, %v716_v12 }
 0x11e   : > { %v728_v0 = vadd.f32 %v724_v53, %v696_v36  ;;  %v673_v43 = vadd.f32 %v669_v4, %v661_v7  ;;  %v737_v42 = vmul.f32 %v1741_v30, %v696_v36 }
 0x11f   : > { %v725_v23 = vmul.f32 %v1723_v26, %v672_v27  ;;  %v694_v63 = vmul.f32 %v1691_v32, %v650_v60  ;;  %v670_v59 = vmul.f32 %v1688_v28, %v650_v60  ;;  %v718_v2 = vmul.f32 0.0, %v697_v22 }
 0x120   : > { %v740_v24 = vadd.f32 %v736_v61, %v728_v0  ;;  %v714_v5 = vmul.f32 0.0, %v673_v43 }
 0x121   : > { %v729_v37 = vadd.f32 %v725_v23, %v697_v22  ;;  %v698_v41 = vadd.f32 %v694_v63, %v686_v45  ;;  %v674_v20 = vadd.f32 %v670_v59, %v662_v44  ;;  %v738_v32 = vmul.f32 %v1741_v30, %v718_v2  ;;  %v1200_v45 = vld [vmem:[%s1946_s1 + $0x2] ss:$0 sm:$0xff] }
 0x122   : > { %1278 = vmatprep.mubr.msk.f32.mxu1 %vm318_vm0, %v740_v24  ;;  %v726_v25 = vmul.f32 %v1723_v26, %v714_v5  ;;  %v311_v46 = vmul.f32 %v1200_v45, %v1594_v17  ;;  %v310_v47 = vmul.f32 %v1200_v45, %v1592_v16  ;;  %v313_v1 = vmul.f32 %v1200_v45, %v1602_v19 }
 0x123   : > { %v741_v13 = vadd.f32 %v737_v42, %v729_v37  ;;  %v727_v31 = vmul.f32 %v1723_v26, %v674_v20  ;;  %v739_v28 = vmul.f32 %v1741_v30, %v698_v41  ;;  %v954_v26 = vld [vmem:[%s1950_s5 + $0x8] sm:$0xff]  ;;  %v955_v30 = vld [vmem:[%s1950_s5 + $0x10] sm:$0xff]  ;;  %v312_v11 = vmul.f32 %v1200_v45, %v1596_v18 }
 0x124   : > { %v730_v34 = vadd.f32 %v726_v25, %v698_v41  ;;  %v1314_v40 = vpack.c.bf16 %v954_v26, %v953_v39  ;;  %v1318_v44 = vpack.c.bf16 %v956_v21, %v955_v30 }
 0x125   : > { %1279 = vmatmul.mubr.msk.f32.vlgmr.msra.gmra.mrb[0].mxu1 %vm318_vm0, %v741_v13  ;;  %v731_v6 = vadd.f32 %v727_v31, %v699_v51 }
 0x126   : > { %v742_v56 = vadd.f32 %v738_v32, %v730_v34  ;;  %1315 = vmatprep.subr.bf16.mxu0 %v1314_v40  ;;  %1322 = vmatprep.subr.bf16.mxu1 %v1314_v40 }
 0x127   : > { %v743_v35 = vadd.f32 %v739_v28, %v731_v6  ;;  %1317 = vmatpush3.bf16.msra.mxu0 %v1314_v40  ;;  %1324 = vmatpush3.bf16.msra.mxu1 %v1314_v40 }
 0x128   : > { %1281 = vmatprep.mubr.msk.f32.mxu1 %vm318_vm0, %v742_v56  ;;  %1319 = vmatprep.subr.bf16.mxu0 %v1318_v44 }
 0x129   : > { %1282 = vmatmul.mubr.msk.f32.gmra.mrb[2].mxu1 %vm318_vm0, %v743_v35  ;;  %1323 = vmatprep.subr.bf16.mxu1 %v1318_v44 }
 0x12b   : > { %1321 = vmatpush3.bf16.msra.mxu0 %v1318_v44  ;;  %1325 = vmatpush3.bf16.msra.mxu1 %v1318_v44 }
 0x1f8   : > { %v1280_v33 = vpop.f32.mrb[0].mxu1 }
 0x1f9   : > { %v1846_v49 = vadd.f32 %v1280_v33, %v311_v46  ;;  %v826_v51 = vpop.f32.mrb[1].mxu1 }
 0x1fa   : > { %v1848_v50 = vadd.f32 %v826_v51, %v310_v47 }
 0x1fb   : > { %v1852_v48 = vmul.f32 0.70710677, %v1846_v49 }
 0x1fc   : > { %v1856_v52 = vmul.f32 0.70710677, %v1848_v50  ;;  %v1283_v29 = vpop.f32.mrb[2].mxu1 }
 0x1fd   : > { %v854_v17 = vand.u32 2147483647, %v1852_v48  ;;  %v1860_v62 = vadd.f32 %v1283_v29, %v313_v1  ;;  %v836_v57 = vpop.f32.mrb[3].mxu1  ;;  %vm934_vm7 = vcmp.ge.f32.partialorder %v1852_v48, 0.0 }
 0x1fe   : > { %v853_v16 = vand.u32 2147483647, %v1856_v52  ;;  %v1862_v54 = vadd.f32 %v836_v57, %v312_v11  ;;  %vm933_vm8 = vcmp.ge.f32.partialorder %v1856_v52, 0.0 }
 0x1ff   : > { %v858_v12 = vmul.f32 0.3275911, %v854_v17  ;;  %v1865_v3 = vmul.f32 0.70710677, %v1860_v62  ;;  %v910_v7 = vsub.f32 0.0, %v854_v17 }
 0x200   : > { %v857_v19 = vmul.f32 0.3275911, %v853_v16  ;;  %v1868_v18 = vmul.f32 0.70710677, %v1862_v54  ;;  %v909_v22 = vsub.f32 0.0, %v853_v16 }
 0x201   : > { %v862_v38 = vadd.f32 1.0, %v858_v12  ;;  %v856_v53 = vand.u32 2147483647, %v1865_v3  ;;  %v914_v0 = vmul.f32 %v910_v7, %v854_v17  ;;  %vm936_vm9 = vcmp.ge.f32.partialorder %v1865_v3, 0.0  ;;  %v1214_v3 = vld [vmem:[%s1951_s6] ss:$0 sm:$0xff] }
 0x202   : > { %v861_v58 = vadd.f32 1.0, %v857_v19  ;;  %v855_v4 = vand.u32 2147483647, %v1868_v18  ;;  %v913_v43 = vmul.f32 %v909_v22, %v853_v16  ;;  %vm935_vm10 = vcmp.ge.f32.partialorder %v1868_v18, 0.0 }
 0x203   : > { %1369 = vrcp.f32 %v862_v38  ;;  %v860_v15 = vmul.f32 0.3275911, %v856_v53  ;;  %v912_v42 = vsub.f32 0.0, %v856_v53  ;;  %v919_v37 = vmul.f32 1.442695, %v914_v0 }
 0x204   : > { %1371 = vrcp.f32 %v861_v58  ;;  %v859_v36 = vmul.f32 0.3275911, %v855_v4  ;;  %v911_v59 = vsub.f32 0.0, %v855_v4  ;;  %v917_v20 = vmul.f32 1.442695, %v913_v43 }
 0x205   : > { %v864_v27 = vadd.f32 1.0, %v860_v15  ;;  %v916_v13 = vmul.f32 %v912_v42, %v856_v53 }
 0x206   : > { %v863_v55 = vadd.f32 1.0, %v859_v36  ;;  %v915_v32 = vmul.f32 %v911_v59, %v855_v4 }
 0x207   : > { %1373 = vrcp.f32 %v864_v27  ;;  %v923_v26 = vmul.f32 1.442695, %v916_v13 }
 0x208   : > { %1375 = vrcp.f32 %v863_v55  ;;  %v921_v44 = vmul.f32 1.442695, %v915_v32 }
 0x209   : > { %1377 = vpow2.f32 %v919_v37 }
 0x20a   : > { %1379 = vpow2.f32 %v917_v20 }
 0x20b   : > { %1381 = vpow2.f32 %v923_v26 }
 0x20c   : > { %1383 = vpow2.f32 %v921_v44 }
 0x20d   : > { %v1370_v60 = vpop.eup %1369 }
 0x20e   : > { %v1372_v61 = vpop.eup %1371  ;;  %v874_v23 = vmul.f32 1.0614054, %v1370_v60 }
 0x20f   : > { %v873_v63 = vmul.f32 1.0614054, %v1372_v61 }
 0x210   : > { %v878_v24 = vadd.f32 -1.4531521, %v874_v23 }
 0x211   : > { %v877_v5 = vadd.f32 -1.4531521, %v873_v63  ;;  %v1374_v2 = vpop.eup %1373 }
 0x212   : > { %v882_v41 = vmul.f32 %v1370_v60, %v878_v24  ;;  %v1376_v25 = vpop.eup %1375  ;;  %v876_v34 = vmul.f32 1.0614054, %v1374_v2 }
 0x213   : > { %v881_v31 = vmul.f32 %v1372_v61, %v877_v5  ;;  %v875_v28 = vmul.f32 1.0614054, %v1376_v25  ;;  %v1378_v58 = vpop.eup %1377 }
 0x214   : > { %v886_v6 = vadd.f32 1.4214138, %v882_v41  ;;  %v880_v35 = vadd.f32 -1.4531521, %v876_v34  ;;  %v1380_v15 = vpop.eup %1379 }
 0x215   : > { %v885_v56 = vadd.f32 1.4214138, %v881_v31  ;;  %v879_v40 = vadd.f32 -1.4531521, %v875_v28  ;;  %v1382_v42 = vpop.eup %1381  ;;  %v845_v31 = vmul.f32 0.5, %v1848_v50 }
 0x216   : > { %v890_v39 = vmul.f32 %v1370_v60, %v886_v6  ;;  %v884_v21 = vmul.f32 %v1374_v2, %v880_v35  ;;  %v1384_v24 = vpop.eup %1383 }
 0x217   : > { %v889_v30 = vmul.f32 %v1372_v61, %v885_v56  ;;  %v883_v46 = vmul.f32 %v1376_v25, %v879_v40 }
 0x218   : > { %v894_v45 = vadd.f32 -0.28449672, %v890_v39  ;;  %v888_v33 = vadd.f32 1.4214138, %v884_v21  ;;  %v847_v39 = vmul.f32 0.5, %v1862_v54 }
 0x219   : > { %v893_v47 = vadd.f32 -0.28449672, %v889_v30  ;;  %v887_v1 = vadd.f32 1.4214138, %v883_v46 }
 0x21a   : > { %v898_v51 = vmul.f32 %v1370_v60, %v894_v45  ;;  %v892_v17 = vmul.f32 %v1374_v2, %v888_v33 }
 0x21b   : > { %v897_v11 = vmul.f32 %v1372_v61, %v893_v47  ;;  %v891_v16 = vmul.f32 %v1376_v25, %v887_v1 }
 0x21c   : > { %v902_v29 = vadd.f32 0.2548296, %v898_v51  ;;  %v896_v12 = vadd.f32 -0.28449672, %v892_v17 }
 0x21d   : > { %v901_v57 = vadd.f32 0.2548296, %v897_v11  ;;  %v895_v38 = vadd.f32 -0.28449672, %v891_v16 }
 0x21e   : > { %v906_v19 = vmul.f32 %v1370_v60, %v902_v29  ;;  %v900_v4 = vmul.f32 %v1374_v2, %v896_v12 }
 0x21f   : > { %v905_v53 = vmul.f32 %v1372_v61, %v901_v57  ;;  %v899_v27 = vmul.f32 %v1376_v25, %v895_v38 }
 0x220   : > { %v926_v36 = vmul.f32 %v1378_v58, %v906_v19  ;;  %v904_v7 = vadd.f32 0.2548296, %v900_v4 }
 0x221   : > { %v925_v55 = vmul.f32 %v1380_v15, %v905_v53  ;;  %v903_v0 = vadd.f32 0.2548296, %v899_v27 }
 0x222   : > { %v930_v22 = vsub.f32 1.0, %v926_v36  ;;  %v908_v43 = vmul.f32 %v1374_v2, %v904_v7  ;;  %v846_v2 = vmul.f32 0.5, %v1846_v49  ;;  %v848_v49 = vmul.f32 0.5, %v1860_v62 }
 0x223   : > { %v929_v23 = vsub.f32 1.0, %v925_v55  ;;  %v907_v59 = vmul.f32 %v1376_v25, %v903_v0 }
 0x224   : > { %v938_v63 = vsub.f32 0.0, %v930_v22  ;;  %v928_v37 = vmul.f32 %v1382_v42, %v908_v43 }
 0x225   : > { %v937_v60 = vsub.f32 0.0, %v929_v23  ;;  %v927_v61 = vmul.f32 %v1384_v24, %v907_v59 }
 0x226   : > { %v942_v5 = vsel %vm934_vm7, %v930_v22, %v938_v63  ;;  %v932_v13 = vsub.f32 1.0, %v928_v37 }
 0x227   : > { %v946_v41 = vadd.f32 1.0, %v942_v5  ;;  %v941_v20 = vsel %vm933_vm8, %v929_v23, %v937_v60  ;;  %v931_v32 = vsub.f32 1.0, %v927_v61 }
 0x228   : > { %v945_v34 = vadd.f32 1.0, %v941_v20  ;;  %v940_v6 = vsub.f32 0.0, %v932_v13 }
 0x229   : > { %v939_v48 = vsub.f32 0.0, %v931_v32  ;;  %v950_v28 = vmul.f32 %v946_v41, %v846_v2 }
 0x22a   : > { %v949_v25 = vmul.f32 %v945_v34, %v845_v31  ;;  %v944_v56 = vsel %vm936_vm9, %v932_v13, %v940_v6 }
 0x22b   : > { %v948_v52 = vadd.f32 1.0, %v944_v56  ;;  %v943_v35 = vsel %vm935_vm10, %v931_v32, %v939_v48 }
 0x22c   : > { %1292 = vmatprep.mubr.msk.f32.mxu0 %vm318_vm0, %v949_v25  ;;  %v947_v50 = vadd.f32 1.0, %v943_v35 }
 0x22d   : > { %1293 = vmatmul.mubr.msk.f32.vlgmr.msra.gmra.mrb[4].mxu0 %vm318_vm0, %v950_v28  ;;  %v952_v40 = vmul.f32 %v948_v52, %v848_v49 }
 0x22e   : > { %v951_v26 = vmul.f32 %v947_v50, %v847_v39 }
 0x230   : > { %1295 = vmatprep.mubr.msk.f32.mxu1 %vm318_vm0, %v951_v26 }
 0x231   : > { %1296 = vmatmul.mubr.msk.f32.vlgmr.msra.gmra.mrb[4].mxu1 %vm318_vm0, %v952_v40 }
 0x300   : > { %v1294_v18 = vpop.f32.mrb[4].mxu0 }
 0x301   : > { %v1048_v30 = vadd.f32 %v1294_v18, %v1214_v3  ;;  %v1042_v21 = vpop.f32.mrb[5].mxu0 }
 0x302   : > { %v1043_v44 = vadd.f32 %v1214_v3, %v1042_v21 }
 0x303   : > { %v1220_v54 = vmul.f32 -1.442695, %v1048_v30 }
 0x304   : > { %v1219_v45 = vmul.f32 -1.442695, %v1043_v44  ;;  %v1297_v46 = vpop.f32.mrb[4].mxu1 }
 0x305   : > { %1385 = vpow2.f32 %v1220_v54  ;;  %v1058_v62 = vadd.f32 %v1297_v46, %v1214_v3  ;;  %v1052_v47 = vpop.f32.mrb[5].mxu1 }
 0x306   : > { %1387 = vpow2.f32 %v1219_v45  ;;  %v1053_v33 = vadd.f32 %v1214_v3, %v1052_v47 }
 0x307   : > { %v1222_v51 = vmul.f32 -1.442695, %v1058_v62 }
 0x308   : > { %v1221_v1 = vmul.f32 -1.442695, %v1053_v33 }
 0x309   : > { %1389 = vpow2.f32 %v1222_v51 }
 0x30a   : > { %1391 = vpow2.f32 %v1221_v1 }
 0x30f   : > { %v1386_v11 = vpop.eup %1385 }
 0x310   : > { %v1388_v17 = vpop.eup %1387  ;;  %v1074_v16 = vadd.f32 1.0, %v1386_v11 }
 0x311   : > { %v1073_v29 = vadd.f32 1.0, %v1388_v17 }
 0x313   : > { %1393 = vrcp.f32 %v1073_v29  ;;  %v1390_v57 = vpop.eup %1389 }
 0x314   : > { %v1392_v12 = vpop.eup %1391  ;;  %1395 = vrcp.f32 %v1074_v16  ;;  %v1076_v38 = vadd.f32 1.0, %v1390_v57 }
 0x315   : > { %v1075_v19 = vadd.f32 1.0, %v1392_v12 }
 0x317   : > { %1397 = vrcp.f32 %v1075_v19 }
 0x318   : > { %1399 = vrcp.f32 %v1076_v38 }
 0x31d   : > { %v1394_v58 = vpop.eup %1393 }
 0x31e   : > { %1089 = vrot.lane.b32.xlu0 %v1394_v58, %s1466_s20  ;;  %v1396_v53 = vpop.eup %1395 }
 0x321   : > { %v1398_v4 = vpop.eup %1397 }
 0x322   : > { %1091 = vrot.lane.b32.xlu0 %v1396_v53, %s1466_s20  ;;  %1093 = vrot.lane.b32.xlu1 %v1398_v4, %s1466_s20  ;;  %v1400_v15 = vpop.eup %1399 }
 0x326   : > { %1095 = vrot.lane.b32.xlu1 %v1400_v15, %s1466_s20 }
 0x390   : > { %v1090_v36 = vpop.permute.xlu0 %1089 }
 0x391   : > { %v1101_v27 = vmul.f32 %v1090_v36, %v1043_v44 }
 0x393   : > { %v1105_v55 = vadd.f32 %v1101_v27, %v1580_v8 }
 0x394   : > { %v1092_v7 = vpop.permute.xlu0 %1091  ;;  %v1094_v22 = vpop.permute.xlu1 %1093 }
 0x395   : > { %1109 = vst.msk [vmem:[%s274_s23] sm:$0xff] %vm318_vm0, %v1105_v55  ;;  %v1102_v0 = vmul.f32 %v1092_v7, %v1048_v30  ;;  %v1103_v23 = vmul.f32 %v1094_v22, %v1053_v33 }
 0x397   : > { %v1106_v43 = vadd.f32 %v1102_v0, %v1582_v9  ;;  %v1107_v42 = vadd.f32 %v1103_v23, %v1584_v10 }
 0x398   : > { %v1096_v63 = vpop.permute.xlu1 %1095 }
 0x399   : > { %1110 = vst.msk [vmem:[%s274_s23 + $0x8] sm:$0xff] %vm318_vm0, %v1106_v43  ;;  %1111 = vst.msk [vmem:[%s274_s23 + $0x10] sm:$0xff] %vm318_vm0, %v1107_v42  ;;  %v1104_v8 = vmul.f32 %v1096_v63, %v1058_v62 }
 0x39b   : > { %v1108_v9 = vadd.f32 %v1104_v8, %v1589_v14 }
 0x39d   : > { %1112 = vst.msk [vmem:[%s274_s23 + $0x18] sm:$0xff] %vm318_vm0, %v1108_v9 }
 0x39e   : > { %1414 = shalt.err (!%p1411_p3)
}
 0x39f   : > { %s1415_s19 = scalar_lea.hbm %s1898_s14, 512  ;;  %s1419_s22 = scalar_lea.hbm %s1952_s7, 2048 }
 0x3a0   : > { %p1416_p4 = scmp.ne.s32.totalorder %s1898_s14, %s1415_s19  ;;  %p1420_p9 = scmp.lt.u32.totalorder %s1898_s14, %s1952_s7 }
 0x3a1   : > { %p1421_p10 = scmp.lt.u32.totalorder %s1419_s22, %s1415_s19  ;;  %p1423_p12 = scmp.lt.u32.totalorder %s1415_s19, %s1898_s14 }
 0x3a2   : > { %p1417_p7 = pnand %p1416_p4, %p1548_p5 }
 0x3a3   : > { %p1422_p11 = por %p1421_p10, %p1420_p9 }
 0x3a4   : > { %p1418_p8 = pneg %p1417_p7 }
 0x3a5   : > { %p1424_p13 = por %p1423_p12, %p1422_p11 }
 0x3a7   : > { %p1425_p0 = pnand %p1424_p13, %p1418_p8 }
 0x3a9   : > { %1428 = shalt.err (!%p1425_p0)
}
 0x3aa   : > { %s1468_s9 = smov 128   ;;  %s1469_s13 = smov 8  }
 0x3ab   : > { %1326 = dma.vmem_to_hbm [thread:$0]  (%p1548_p5), %s1900_s29, 512, %s1898_s14, %s1904_s28, %s1468_s9, %s1468_s9, %s1469_s13  }
 0x3ac PF: > { %p1332_p1 = scmp.ge.s32.totalorder %s1463_s27, 2  ;;  %s1143_s15 = sand.u32 1, %s1451_s24  }
 0x3ad   : > { %s1144_s16 = scalar_lea.sflag [#allocation3], %s1143_s15 }
 0x3ae   : > { %p1329_p2 = pnand %p1332_p1, %p1552_p6 }
 0x3b0   : > { %1446 = dma.done.wait (!%p1329_p2), %s1144_s16, 512  }
 0x3b1   : > { %1448 = vsyncadd (!%p1329_p2), %s1144_s16, 4294966784  ;;  %p17_p3 = scmp.ge.s32.totalorder %s1535_s30, 6   ;;  %s1955_s24 = smov %s1455_s25 }
 0x3b2   : > { %s1956_s25 = smov %s1459_s26  ;;  %s1957_s26 = smov %s1546_s10 }
 0x3b3   : > { %s1958_s27 = smov %s1535_s30  ;;  %19 = sbr.rel (!%p17_p3) target bundleno = 3 (0x3), region = 83 }
 0x3ba   :  { %1149 = vsyncpa [#allocation3], 1 }
 0x3bb   :  { %1151 = vsyncpa [#allocation3 + $0x1], 1 }

</bundles_post_ra>
